<compile_context>
chip_gen: v5e
topology: v5e:2x2
jax: 0.10.0
libtpu: 0.0.40
codegen_flags: <defaults>
</compile_context>

<pallas_src>
import functools

import jax
import jax.numpy as jnp
from jax import lax
from jax.experimental import pallas as pl
from jax.experimental.pallas import tpu as pltpu

LANE = 128


def _vmem_capacity_bytes():
    try:
        return int(getattr(pltpu.get_tpu_info(), "vmem_capacity_bytes", 64 << 20))
    except Exception:
        return 64 << 20


_VMEM_CAP = _vmem_capacity_bytes()
_VMEM_LIMIT_BYTES = int(0.80 * _VMEM_CAP)        # scoped limit handed to Mosaic
_RESIDENT_BUDGET_BYTES = int(0.60 * _VMEM_CAP)   # budget for whole-graph-resident fused path
_RESIDENT_MAX_N = 2048                           # larger graphs -> row-parallel tiled path (2 TCs on v7x)


# ----------------------------- kernels -------------------------------------


def _mlp_body(x, w1_ref, b1_ref, s1_ref, t1_ref,
              w2_ref, b2_ref, s2_ref, t2_ref, w3_ref, b3_ref):
    """Linear -> ReLU -> BN -> Linear -> ReLU -> BN -> Linear (eval mode, BN folded)."""
    h = jnp.dot(x, w1_ref[...], preferred_element_type=jnp.float32) + b1_ref[...]
    h = jnp.maximum(h, 0.0)                       # ReLU
    h = h * s1_ref[...] + t1_ref[...]             # BatchNorm1d (running stats, folded)
    # F.dropout(p=0.5) -> identity in eval mode
    h = jnp.dot(h, w2_ref[...], preferred_element_type=jnp.float32) + b2_ref[...]
    h = jnp.maximum(h, 0.0)
    h = h * s2_ref[...] + t2_ref[...]
    return jnp.dot(h, w3_ref[...], preferred_element_type=jnp.float32) + b3_ref[...]


def _appnp_fused_kernel(x_ref, w1_ref, b1_ref, s1_ref, t1_ref,
                        w2_ref, b2_ref, s2_ref, t2_ref, w3_ref, b3_ref,
                        adj_hbm_ref, out_ref, adj_vmem, adj_sem, *, k_hops, alpha):
    """Whole-graph-resident path: adjacency DMA overlapped with the MLP, then K hops in VMEM."""
    adj_cp = pltpu.make_async_copy(adj_hbm_ref, adj_vmem, adj_sem)
    adj_cp.start()                                                    # hide N^2 load behind the MLP
    h = _mlp_body(x_ref[...], w1_ref, b1_ref, s1_ref, t1_ref,
                  w2_ref, b2_ref, s2_ref, t2_ref, w3_ref, b3_ref)     # [N, Op] f32
    adj_cp.wait()
    adj = adj_vmem[...]                                               # [N, N] bf16

    def hop(_, z):
        return ((1.0 - alpha) * jnp.dot(adj, z.astype(jnp.bfloat16),
                                        preferred_element_type=jnp.float32)
                + alpha * h)

    out_ref[...] = lax.fori_loop(0, k_hops, hop, h, unroll=True)


def _mlp_kernel(x_ref, w1_ref, b1_ref, s1_ref, t1_ref,
                w2_ref, b2_ref, s2_ref, t2_ref, w3_ref, b3_ref, h_ref):
    """Row-tiled MLP (weights resident across the row grid)."""
    h_ref[...] = _mlp_body(x_ref[...], w1_ref, b1_ref, s1_ref, t1_ref,
                           w2_ref, b2_ref, s2_ref, t2_ref, w3_ref, b3_ref)


def _appnp_step_kernel(adj_ref, z_ref, h_ref, out_ref, *, alpha):
    """One hop for a block of destination rows: (1-a)*A_hat[rows] @ z + a*h[rows].

    Adjacency block is bf16; z cast to bf16 for the MXU; accumulation/output in f32.
    """
    out_ref[...] = ((1.0 - alpha) * jnp.dot(adj_ref[...], z_ref[...].astype(jnp.bfloat16),
                                            preferred_element_type=jnp.float32)
                    + alpha * h_ref[...])


# ----------------------------- wrappers ------------------------------------


def _round_up(n, m):
    return (n + m - 1) // m * m


def _pad_cols(a, new_cols):
    pad = new_cols - a.shape[-1]
    if pad == 0:
        return a
    return jnp.pad(a, [(0, 0)] * (a.ndim - 1) + [(0, pad)])


def _fold_bn(gamma, beta, mean, var, eps=1e-5):
    scale = gamma / jnp.sqrt(var + eps)
    shift = beta - mean * scale
    return scale, shift


def _prepare_padded_params(params):
    """Fold BN to scale/shift and zero-pad hidden/out lane dims to multiples of 128."""
    hidden = params["w1"].shape[1]
    out = params["w3"].shape[1]
    hp = _round_up(hidden, LANE)
    op = _round_up(out, LANE)
    s1, t1 = _fold_bn(params["bn1_gamma"], params["bn1_beta"],
                      params["bn1_mean"], params["bn1_var"])
    s2, t2 = _fold_bn(params["bn2_gamma"], params["bn2_beta"],
                      params["bn2_mean"], params["bn2_var"])
    weight_args = (
        _pad_cols(params["w1"], hp),                                   # [Fin, Hp]
        _pad_cols(params["b1"].reshape(1, -1), hp),
        _pad_cols(s1.reshape(1, -1), hp),
        _pad_cols(t1.reshape(1, -1), hp),
        jnp.pad(params["w2"], ((0, hp - hidden), (0, hp - hidden))),   # [Hp, Hp]
        _pad_cols(params["b2"].reshape(1, -1), hp),
        _pad_cols(s2.reshape(1, -1), hp),
        _pad_cols(t2.reshape(1, -1), hp),
        jnp.pad(params["w3"], ((0, hp - hidden), (0, op - out))),      # [Hp, Op]
        _pad_cols(params["b3"].reshape(1, -1), op),
    )
    return weight_args, op


def _pick_tile(n, op, vmem_budget_bytes):
    """Largest row tile whose working set fits the VMEM budget (conservative: double buffers)."""
    candidates = [t for t in (1024, 512, 256, 128, 64, 32, 16) if t <= n and n % t == 0]
    if not candidates:
        return n
    z_resident = 2 * n * op * 4                    # full z block (assume double-buffered)
    for t in candidates:
        adj_slab = 2 * t * n * 2                   # double-buffered bf16 adjacency row slab
        row_blocks = 2 * (t * op * 4) * 2          # h block + out block, double-buffered
        if adj_slab + z_resident + row_blocks <= vmem_budget_bytes:
            return t
    return candidates[-1]


def _appnp_tiled(x, adj_bf16, weight_args, op, tile, k_hops, alpha):
    """Scalable path: row-block grid over the N^2 adjacency, weights/z resident per call."""
    n, fin = x.shape
    grid = (n // tile,)
    cp = pltpu.CompilerParams(dimension_semantics=("parallel",),
                              vmem_limit_bytes=_VMEM_LIMIT_BYTES)

    def resident(shape):
        return pl.BlockSpec(shape, lambda i: tuple(0 for _ in shape))

    # 1) MLP: row-tiled x, resident (un-tiled) weights, lane-dense [tile, Op] output slabs.
    h = pl.pallas_call(
        _mlp_kernel,
        out_shape=jax.ShapeDtypeStruct((n, op), jnp.float32),
        grid=grid,
        in_specs=[pl.BlockSpec((tile, fin), lambda i: (i, 0))]
                 + [resident(w.shape) for w in weight_args],
        out_specs=pl.BlockSpec((tile, op), lambda i: (i, 0)),
        compiler_params=cp,
    )(x, *weight_args)

    # 2) K propagation hops: stream (tile, N) bf16 adjacency rows; z/h kept small ([N, Op] f32).
    step = pl.pallas_call(
        functools.partial(_appnp_step_kernel, alpha=alpha),
        out_shape=jax.ShapeDtypeStruct((n, op), jnp.float32),
        grid=grid,
        in_specs=[pl.BlockSpec((tile, n), lambda i: (i, 0)),     # A_hat row block (bf16)
                  pl.BlockSpec((n, op), lambda i: (0, 0)),       # full z (resident)
                  pl.BlockSpec((tile, op), lambda i: (i, 0))],   # h row block
        out_specs=pl.BlockSpec((tile, op), lambda i: (i, 0)),
        compiler_params=cp,
    )
    z = h
    for _ in range(k_hops):
        z = step(adj_bf16, z, h)
    return z


def appnp_forward(x, adj_norm, params, *, k_hops=10, alpha=0.1, force_tile_n=None):
    n, fin = x.shape
    out_channels = params["w3"].shape[1]
    weight_args, op = _prepare_padded_params(params)
    hp = weight_args[0].shape[1]

    # Adjacency lives in HBM as bf16: halves the dominant N^2 byte stream; matmuls accumulate f32.
    adj_bf16 = adj_norm.astype(jnp.bfloat16)

    weight_bytes = 4 * sum(int(a.size) for a in weight_args)
    # adjacency scratch (bf16) + x + two [N,Hp] MLP temporaries + h/z/out/hop-temp [N,Op] + weights
    resident_bytes = (2 * n * n
                      + 4 * (n * fin + 2 * n * hp + 4 * n * op)
                      + weight_bytes)
    use_resident = (force_tile_n is None
                    and resident_bytes <= _RESIDENT_BUDGET_BYTES
                    and n <= _RESIDENT_MAX_N)

    if use_resident:
        kernel = functools.partial(_appnp_fused_kernel, k_hops=k_hops, alpha=alpha)
        out_p = pl.pallas_call(
            kernel,
            out_shape=jax.ShapeDtypeStruct((n, op), jnp.float32),
            in_specs=[pl.BlockSpec(memory_space=pltpu.MemorySpace.VMEM)] * 11
                     + [pl.BlockSpec(memory_space=pl.ANY)],          # adjacency stays in HBM
            out_specs=pl.BlockSpec(memory_space=pltpu.MemorySpace.VMEM),
            scratch_shapes=[pltpu.VMEM((n, n), jnp.bfloat16),         # adjacency landing buffer
                            pltpu.SemaphoreType.DMA(())],
            compiler_params=pltpu.CompilerParams(vmem_limit_bytes=_VMEM_LIMIT_BYTES),
        )(x, *weight_args, adj_bf16)
    else:
        tile = (force_tile_n if force_tile_n is not None
                else _pick_tile(n, op, int(0.75 * _VMEM_LIMIT_BYTES)))
        assert n % tile == 0, (n, tile)
        out_p = _appnp_tiled(x, adj_bf16, weight_args, op, tile, k_hops, alpha)

    return out_p[:, :out_channels]


# ----------------------------- reference / setup ----------------------------


def appnp_reference(x, adj_norm, params, *, k_hops=10, alpha=0.1, eps=1e-5):
    def bn(h, g, b, m, v):
        return (h - m) / jnp.sqrt(v + eps) * g + b

    h = jnp.maximum(x @ params["w1"] + params["b1"], 0.0)
    h = bn(h, params["bn1_gamma"], params["bn1_beta"], params["bn1_mean"], params["bn1_var"])
    h = jnp.maximum(h @ params["w2"] + params["b2"], 0.0)
    h = bn(h, params["bn2_gamma"], params["bn2_beta"], params["bn2_mean"], params["bn2_var"])
    h = h @ params["w3"] + params["b3"]
    z = h
    for _ in range(k_hops):
        z = (1.0 - alpha) * adj_norm @ z + alpha * h
    return z


def init_params(key, in_channels, hidden_channels, out_channels):
    ks = jax.random.split(key, 3)
    scale = 0.1

    def lin(k, fan_in, fan_out):
        kw, kb = jax.random.split(k)
        return (scale * jax.random.normal(kw, (fan_in, fan_out), jnp.float32),
                scale * jax.random.normal(kb, (fan_out,), jnp.float32))

    w1, b1 = lin(ks[0], in_channels, hidden_channels)
    w2, b2 = lin(ks[1], hidden_channels, hidden_channels)
    w3, b3 = lin(ks[2], hidden_channels, out_channels)
    ones = jnp.ones((hidden_channels,), jnp.float32)
    zeros = jnp.zeros((hidden_channels,), jnp.float32)
    return {
        "w1": w1, "b1": b1,
        "bn1_gamma": ones, "bn1_beta": zeros, "bn1_mean": zeros, "bn1_var": ones,
        "w2": w2, "b2": b2,
        "bn2_gamma": ones, "bn2_beta": zeros, "bn2_mean": zeros, "bn2_var": ones,
        "w3": w3, "b3": b3,
    }


def build_normalized_adjacency(edge_index, num_nodes):
    """Dense A_hat = D^{-1/2} (A + I) D^{-1/2} with adj[i, j] = 1 iff edge j -> i."""
    src, dst = edge_index[0], edge_index[1]
    a = jnp.zeros((num_nodes, num_nodes), jnp.float32)
    a = a.at[dst, src].set(1.0)
    a = jnp.maximum(a, jnp.eye(num_nodes, dtype=jnp.float32))        # add self-loops
    deg = jnp.sum(a, axis=1)
    dinv = jnp.where(deg > 0, 1.0 / jnp.sqrt(deg), 0.0)
    return a * dinv[:, None] * dinv[None, :]


if __name__ == "__main__":
    N, in_channels, hidden_channels, out_channels = 32, 8, 32, 4
    K, alpha = 10, 0.1

    key = jax.random.PRNGKey(0)
    k_feat, k_param = jax.random.split(key)
    node_feat = jax.random.normal(k_feat, (N, in_channels), jnp.float32)

    # deterministic undirected ring graph: edges i <-> i+1 (mod N)
    idx = jnp.arange(N, dtype=jnp.int32)
    src = jnp.concatenate([idx, (idx + 1) % N])
    dst = jnp.concatenate([(idx + 1) % N, idx])
    edge_index = jnp.stack([src, dst], axis=0)

    adj_norm = build_normalized_adjacency(edge_index, N)
    params = init_params(k_param, in_channels, hidden_channels, out_channels)

    # primary (fused, whole-graph-resident, DMA-overlapped) path
    out = appnp_forward(node_feat, adj_norm, params, k_hops=K, alpha=alpha)
    out = jax.block_until_ready(out)
    assert out.shape == (N, out_channels), out.shape

    # row-tiled grid path (scalability / multi-TC path), validated against the same reference
    out_tiled = appnp_forward(node_feat, adj_norm, params, k_hops=K, alpha=alpha,
                              force_tile_n=16)
    out_tiled = jax.block_until_ready(out_tiled)

    ref = appnp_reference(node_feat, adj_norm, params, k_hops=K, alpha=alpha)
    # bf16 adjacency/propagation operands (f32 accumulation) -> slightly looser tolerance vs f32 ref
    assert jnp.allclose(out, ref, atol=2e-2, rtol=2e-2)
    assert jnp.allclose(out_tiled, ref, atol=2e-2, rtol=2e-2)
    print("KERNEL_OK")
</pallas_src>

<mosaic_0001>
module attributes {stable_mosaic.version = 11 : i64} {
  func.func @_appnp_fused_kernel(%arg0: memref<32x8xf32, #tpu.memory_space<vmem>>, %arg1: memref<8x128xf32, #tpu.memory_space<vmem>>, %arg2: memref<1x128xf32, #tpu.memory_space<vmem>>, %arg3: memref<1x128xf32, #tpu.memory_space<vmem>>, %arg4: memref<1x128xf32, #tpu.memory_space<vmem>>, %arg5: memref<128x128xf32, #tpu.memory_space<vmem>>, %arg6: memref<1x128xf32, #tpu.memory_space<vmem>>, %arg7: memref<1x128xf32, #tpu.memory_space<vmem>>, %arg8: memref<1x128xf32, #tpu.memory_space<vmem>>, %arg9: memref<128x128xf32, #tpu.memory_space<vmem>>, %arg10: memref<1x128xf32, #tpu.memory_space<vmem>>, %arg11: memref<32x32xbf16, #tpu.memory_space<any>>, %arg12: memref<32x128xf32, #tpu.memory_space<vmem>>, %arg13: memref<32x32xbf16, #tpu.memory_space<vmem>>, %arg14: memref<!tpu.dma_semaphore, #tpu.memory_space<semaphore_mem>>) attributes {dimension_semantics = [], scalar_prefetch = 0 : i64, scratch_operands = 2 : i64, tpu.core_type = #tpu.core_type<tc>} {
    tpu.enqueue_dma source(%arg11 : memref<32x32xbf16, #tpu.memory_space<any>>) target(%arg13 : memref<32x32xbf16, #tpu.memory_space<vmem>>) target_semaphore(%arg14 : memref<!tpu.dma_semaphore, #tpu.memory_space<semaphore_mem>>)
    %c0 = arith.constant 0 : index
    %c0_0 = arith.constant 0 : index
    %0 = vector.load %arg0[%c0, %c0_0] : memref<32x8xf32, #tpu.memory_space<vmem>>, vector<32x8xf32>
    %c0_1 = arith.constant 0 : index
    %c0_2 = arith.constant 0 : index
    %1 = vector.load %arg1[%c0_1, %c0_2] : memref<8x128xf32, #tpu.memory_space<vmem>>, vector<8x128xf32>
    %cst = arith.constant dense<0.000000e+00> : vector<32x128xf32>
    %2 = tpu.matmul %0, %1, %cst {dimension_numbers = #tpu.dot_dimension_numbers<[1], [0], [0], [1], [0, 0, 1, 1], [], []>} : vector<32x8xf32>, vector<8x128xf32>, vector<32x128xf32> -> vector<32x128xf32>
    %c0_3 = arith.constant 0 : index
    %c0_4 = arith.constant 0 : index
    %3 = vector.load %arg2[%c0_3, %c0_4] : memref<1x128xf32, #tpu.memory_space<vmem>>, vector<1x128xf32>
    %4 = vector.broadcast %3 : vector<1x128xf32> to vector<32x128xf32>
    %5 = arith.addf %2, %4 : vector<32x128xf32>
    %cst_5 = arith.constant 0.000000e+00 : f32
    %6 = vector.broadcast %cst_5 : f32 to vector<32x128xf32>
    %7 = arith.maximumf %5, %6 : vector<32x128xf32>
    %c0_6 = arith.constant 0 : index
    %c0_7 = arith.constant 0 : index
    %8 = vector.load %arg3[%c0_6, %c0_7] : memref<1x128xf32, #tpu.memory_space<vmem>>, vector<1x128xf32>
    %9 = vector.broadcast %8 : vector<1x128xf32> to vector<32x128xf32>
    %10 = arith.mulf %7, %9 : vector<32x128xf32>
    %c0_8 = arith.constant 0 : index
    %c0_9 = arith.constant 0 : index
    %11 = vector.load %arg4[%c0_8, %c0_9] : memref<1x128xf32, #tpu.memory_space<vmem>>, vector<1x128xf32>
    %12 = vector.broadcast %11 : vector<1x128xf32> to vector<32x128xf32>
    %13 = arith.addf %10, %12 : vector<32x128xf32>
    %c0_10 = arith.constant 0 : index
    %c0_11 = arith.constant 0 : index
    %14 = vector.load %arg5[%c0_10, %c0_11] : memref<128x128xf32, #tpu.memory_space<vmem>>, vector<128x128xf32>
    %cst_12 = arith.constant dense<0.000000e+00> : vector<32x128xf32>
    %15 = tpu.matmul %13, %14, %cst_12 {dimension_numbers = #tpu.dot_dimension_numbers<[1], [0], [0], [1], [0, 0, 1, 1], [], []>} : vector<32x128xf32>, vector<128x128xf32>, vector<32x128xf32> -> vector<32x128xf32>
    %c0_13 = arith.constant 0 : index
    %c0_14 = arith.constant 0 : index
    %16 = vector.load %arg6[%c0_13, %c0_14] : memref<1x128xf32, #tpu.memory_space<vmem>>, vector<1x128xf32>
    %17 = vector.broadcast %16 : vector<1x128xf32> to vector<32x128xf32>
    %18 = arith.addf %15, %17 : vector<32x128xf32>
    %cst_15 = arith.constant 0.000000e+00 : f32
    %19 = vector.broadcast %cst_15 : f32 to vector<32x128xf32>
    %20 = arith.maximumf %18, %19 : vector<32x128xf32>
    %c0_16 = arith.constant 0 : index
    %c0_17 = arith.constant 0 : index
    %21 = vector.load %arg7[%c0_16, %c0_17] : memref<1x128xf32, #tpu.memory_space<vmem>>, vector<1x128xf32>
    %22 = vector.broadcast %21 : vector<1x128xf32> to vector<32x128xf32>
    %23 = arith.mulf %20, %22 : vector<32x128xf32>
    %c0_18 = arith.constant 0 : index
    %c0_19 = arith.constant 0 : index
    %24 = vector.load %arg8[%c0_18, %c0_19] : memref<1x128xf32, #tpu.memory_space<vmem>>, vector<1x128xf32>
    %25 = vector.broadcast %24 : vector<1x128xf32> to vector<32x128xf32>
    %26 = arith.addf %23, %25 : vector<32x128xf32>
    %c0_20 = arith.constant 0 : index
    %c0_21 = arith.constant 0 : index
    %27 = vector.load %arg9[%c0_20, %c0_21] : memref<128x128xf32, #tpu.memory_space<vmem>>, vector<128x128xf32>
    %cst_22 = arith.constant dense<0.000000e+00> : vector<32x128xf32>
    %28 = tpu.matmul %26, %27, %cst_22 {dimension_numbers = #tpu.dot_dimension_numbers<[1], [0], [0], [1], [0, 0, 1, 1], [], []>} : vector<32x128xf32>, vector<128x128xf32>, vector<32x128xf32> -> vector<32x128xf32>
    %c0_23 = arith.constant 0 : index
    %c0_24 = arith.constant 0 : index
    %29 = vector.load %arg10[%c0_23, %c0_24] : memref<1x128xf32, #tpu.memory_space<vmem>>, vector<1x128xf32>
    %30 = vector.broadcast %29 : vector<1x128xf32> to vector<32x128xf32>
    %31 = arith.addf %28, %30 : vector<32x128xf32>
    tpu.wait_dma2 semaphore(%arg14 : memref<!tpu.dma_semaphore, #tpu.memory_space<semaphore_mem>>) src(%arg11 : memref<32x32xbf16, #tpu.memory_space<any>>) dst(%arg13 : memref<32x32xbf16, #tpu.memory_space<vmem>>)
    %c0_25 = arith.constant 0 : index
    %c0_26 = arith.constant 0 : index
    %32 = vector.load %arg13[%c0_25, %c0_26] : memref<32x32xbf16, #tpu.memory_space<vmem>>, vector<32x32xbf16>
    %c0_i32 = arith.constant 0 : i32
    %33 = arith.truncf %31 : vector<32x128xf32> to vector<32x128xbf16>
    %cst_27 = arith.constant dense<0.000000e+00> : vector<32x128xf32>
    %34 = tpu.matmul %32, %33, %cst_27 {dimension_numbers = #tpu.dot_dimension_numbers<[1], [0], [0], [1], [0, 0, 1, 1], [], []>} : vector<32x32xbf16>, vector<32x128xbf16>, vector<32x128xf32> -> vector<32x128xf32>
    %cst_28 = arith.constant 0.899999976 : f32
    %35 = vector.broadcast %cst_28 : f32 to vector<32x128xf32>
    %36 = arith.mulf %35, %34 : vector<32x128xf32>
    %cst_29 = arith.constant 1.000000e-01 : f32
    %37 = vector.broadcast %cst_29 : f32 to vector<32x128xf32>
    %38 = arith.mulf %37, %31 : vector<32x128xf32>
    %39 = arith.addf %36, %38 : vector<32x128xf32>
    %c1_i32 = arith.constant 1 : i32
    %40 = arith.truncf %39 : vector<32x128xf32> to vector<32x128xbf16>
    %cst_30 = arith.constant dense<0.000000e+00> : vector<32x128xf32>
    %41 = tpu.matmul %32, %40, %cst_30 {dimension_numbers = #tpu.dot_dimension_numbers<[1], [0], [0], [1], [0, 0, 1, 1], [], []>} : vector<32x32xbf16>, vector<32x128xbf16>, vector<32x128xf32> -> vector<32x128xf32>
    %cst_31 = arith.constant 0.899999976 : f32
    %42 = vector.broadcast %cst_31 : f32 to vector<32x128xf32>
    %43 = arith.mulf %42, %41 : vector<32x128xf32>
    %cst_32 = arith.constant 1.000000e-01 : f32
    %44 = vector.broadcast %cst_32 : f32 to vector<32x128xf32>
    %45 = arith.mulf %44, %31 : vector<32x128xf32>
    %46 = arith.addf %43, %45 : vector<32x128xf32>
    %c2_i32 = arith.constant 2 : i32
    %47 = arith.truncf %46 : vector<32x128xf32> to vector<32x128xbf16>
    %cst_33 = arith.constant dense<0.000000e+00> : vector<32x128xf32>
    %48 = tpu.matmul %32, %47, %cst_33 {dimension_numbers = #tpu.dot_dimension_numbers<[1], [0], [0], [1], [0, 0, 1, 1], [], []>} : vector<32x32xbf16>, vector<32x128xbf16>, vector<32x128xf32> -> vector<32x128xf32>
    %cst_34 = arith.constant 0.899999976 : f32
    %49 = vector.broadcast %cst_34 : f32 to vector<32x128xf32>
    %50 = arith.mulf %49, %48 : vector<32x128xf32>
    %cst_35 = arith.constant 1.000000e-01 : f32
    %51 = vector.broadcast %cst_35 : f32 to vector<32x128xf32>
    %52 = arith.mulf %51, %31 : vector<32x128xf32>
    %53 = arith.addf %50, %52 : vector<32x128xf32>
    %c3_i32 = arith.constant 3 : i32
    %54 = arith.truncf %53 : vector<32x128xf32> to vector<32x128xbf16>
    %cst_36 = arith.constant dense<0.000000e+00> : vector<32x128xf32>
    %55 = tpu.matmul %32, %54, %cst_36 {dimension_numbers = #tpu.dot_dimension_numbers<[1], [0], [0], [1], [0, 0, 1, 1], [], []>} : vector<32x32xbf16>, vector<32x128xbf16>, vector<32x128xf32> -> vector<32x128xf32>
    %cst_37 = arith.constant 0.899999976 : f32
    %56 = vector.broadcast %cst_37 : f32 to vector<32x128xf32>
    %57 = arith.mulf %56, %55 : vector<32x128xf32>
    %cst_38 = arith.constant 1.000000e-01 : f32
    %58 = vector.broadcast %cst_38 : f32 to vector<32x128xf32>
    %59 = arith.mulf %58, %31 : vector<32x128xf32>
    %60 = arith.addf %57, %59 : vector<32x128xf32>
    %c4_i32 = arith.constant 4 : i32
    %61 = arith.truncf %60 : vector<32x128xf32> to vector<32x128xbf16>
    %cst_39 = arith.constant dense<0.000000e+00> : vector<32x128xf32>
    %62 = tpu.matmul %32, %61, %cst_39 {dimension_numbers = #tpu.dot_dimension_numbers<[1], [0], [0], [1], [0, 0, 1, 1], [], []>} : vector<32x32xbf16>, vector<32x128xbf16>, vector<32x128xf32> -> vector<32x128xf32>
    %cst_40 = arith.constant 0.899999976 : f32
    %63 = vector.broadcast %cst_40 : f32 to vector<32x128xf32>
    %64 = arith.mulf %63, %62 : vector<32x128xf32>
    %cst_41 = arith.constant 1.000000e-01 : f32
    %65 = vector.broadcast %cst_41 : f32 to vector<32x128xf32>
    %66 = arith.mulf %65, %31 : vector<32x128xf32>
    %67 = arith.addf %64, %66 : vector<32x128xf32>
    %c5_i32 = arith.constant 5 : i32
    %68 = arith.truncf %67 : vector<32x128xf32> to vector<32x128xbf16>
    %cst_42 = arith.constant dense<0.000000e+00> : vector<32x128xf32>
    %69 = tpu.matmul %32, %68, %cst_42 {dimension_numbers = #tpu.dot_dimension_numbers<[1], [0], [0], [1], [0, 0, 1, 1], [], []>} : vector<32x32xbf16>, vector<32x128xbf16>, vector<32x128xf32> -> vector<32x128xf32>
    %cst_43 = arith.constant 0.899999976 : f32
    %70 = vector.broadcast %cst_43 : f32 to vector<32x128xf32>
    %71 = arith.mulf %70, %69 : vector<32x128xf32>
    %cst_44 = arith.constant 1.000000e-01 : f32
    %72 = vector.broadcast %cst_44 : f32 to vector<32x128xf32>
    %73 = arith.mulf %72, %31 : vector<32x128xf32>
    %74 = arith.addf %71, %73 : vector<32x128xf32>
    %c6_i32 = arith.constant 6 : i32
    %75 = arith.truncf %74 : vector<32x128xf32> to vector<32x128xbf16>
    %cst_45 = arith.constant dense<0.000000e+00> : vector<32x128xf32>
    %76 = tpu.matmul %32, %75, %cst_45 {dimension_numbers = #tpu.dot_dimension_numbers<[1], [0], [0], [1], [0, 0, 1, 1], [], []>} : vector<32x32xbf16>, vector<32x128xbf16>, vector<32x128xf32> -> vector<32x128xf32>
    %cst_46 = arith.constant 0.899999976 : f32
    %77 = vector.broadcast %cst_46 : f32 to vector<32x128xf32>
    %78 = arith.mulf %77, %76 : vector<32x128xf32>
    %cst_47 = arith.constant 1.000000e-01 : f32
    %79 = vector.broadcast %cst_47 : f32 to vector<32x128xf32>
    %80 = arith.mulf %79, %31 : vector<32x128xf32>
    %81 = arith.addf %78, %80 : vector<32x128xf32>
    %c7_i32 = arith.constant 7 : i32
    %82 = arith.truncf %81 : vector<32x128xf32> to vector<32x128xbf16>
    %cst_48 = arith.constant dense<0.000000e+00> : vector<32x128xf32>
    %83 = tpu.matmul %32, %82, %cst_48 {dimension_numbers = #tpu.dot_dimension_numbers<[1], [0], [0], [1], [0, 0, 1, 1], [], []>} : vector<32x32xbf16>, vector<32x128xbf16>, vector<32x128xf32> -> vector<32x128xf32>
    %cst_49 = arith.constant 0.899999976 : f32
    %84 = vector.broadcast %cst_49 : f32 to vector<32x128xf32>
    %85 = arith.mulf %84, %83 : vector<32x128xf32>
    %cst_50 = arith.constant 1.000000e-01 : f32
    %86 = vector.broadcast %cst_50 : f32 to vector<32x128xf32>
    %87 = arith.mulf %86, %31 : vector<32x128xf32>
    %88 = arith.addf %85, %87 : vector<32x128xf32>
    %c8_i32 = arith.constant 8 : i32
    %89 = arith.truncf %88 : vector<32x128xf32> to vector<32x128xbf16>
    %cst_51 = arith.constant dense<0.000000e+00> : vector<32x128xf32>
    %90 = tpu.matmul %32, %89, %cst_51 {dimension_numbers = #tpu.dot_dimension_numbers<[1], [0], [0], [1], [0, 0, 1, 1], [], []>} : vector<32x32xbf16>, vector<32x128xbf16>, vector<32x128xf32> -> vector<32x128xf32>
    %cst_52 = arith.constant 0.899999976 : f32
    %91 = vector.broadcast %cst_52 : f32 to vector<32x128xf32>
    %92 = arith.mulf %91, %90 : vector<32x128xf32>
    %cst_53 = arith.constant 1.000000e-01 : f32
    %93 = vector.broadcast %cst_53 : f32 to vector<32x128xf32>
    %94 = arith.mulf %93, %31 : vector<32x128xf32>
    %95 = arith.addf %92, %94 : vector<32x128xf32>
    %c9_i32 = arith.constant 9 : i32
    %96 = arith.truncf %95 : vector<32x128xf32> to vector<32x128xbf16>
    %cst_54 = arith.constant dense<0.000000e+00> : vector<32x128xf32>
    %97 = tpu.matmul %32, %96, %cst_54 {dimension_numbers = #tpu.dot_dimension_numbers<[1], [0], [0], [1], [0, 0, 1, 1], [], []>} : vector<32x32xbf16>, vector<32x128xbf16>, vector<32x128xf32> -> vector<32x128xf32>
    %cst_55 = arith.constant 0.899999976 : f32
    %98 = vector.broadcast %cst_55 : f32 to vector<32x128xf32>
    %99 = arith.mulf %98, %97 : vector<32x128xf32>
    %cst_56 = arith.constant 1.000000e-01 : f32
    %100 = vector.broadcast %cst_56 : f32 to vector<32x128xf32>
    %101 = arith.mulf %100, %31 : vector<32x128xf32>
    %102 = arith.addf %99, %101 : vector<32x128xf32>
    %c0_57 = arith.constant 0 : index
    %c0_58 = arith.constant 0 : index
    %103 = vector.load %arg12[%c0_57, %c0_58] : memref<32x128xf32, #tpu.memory_space<vmem>>, vector<32x128xf32>
    tpu.vector_store %arg12[%c0_57, %c0_58], %102 {strides = array<i32>} : memref<32x128xf32, #tpu.memory_space<vmem>>, vector<32x128xf32>,
    return
  }
}

</mosaic_0001>

<bundles_post_ra>
// kernel: tpu_custom_call.1
= control target key start
LH: loop header
LB: loop body
LE: loop exit
PB: predicated region body
PF: predicated region fallthrough
CT: control target
= control target key end

     0   :  { %17 = vsyncpa [#allocation5], 0  ;;  %s990_s0 = inlined_call_operand.vmem [shape: f32[32,8], index: 0, kind: input, shape index: {}]   ;;  %s991_s1 = inlined_call_operand.vmem [shape: f32[8,128], index: 1, kind: input, shape index: {}]   ;;  %s992_s2 = inlined_call_operand.vmem [shape: f32[1,128], index: 2, kind: input, shape index: {}]   ;;  %s993_s3 = inlined_call_operand.vmem [shape: f32[1,128], index: 3, kind: input, shape index: {}]   ;;  %s994_s4 = inlined_call_operand.vmem [shape: f32[1,128], index: 4, kind: input, shape index: {}]   ;;  %s995_s5 = inlined_call_operand.hbm [shape: f32[128,128], index: 5, kind: input, shape index: {}]   ;;  %s996_s6 = inlined_call_operand.vmem [shape: f32[1,128], index: 6, kind: input, shape index: {}]   ;;  %s997_s7 = inlined_call_operand.vmem [shape: f32[1,128], index: 7, kind: input, shape index: {}]   ;;  %s998_s8 = inlined_call_operand.vmem [shape: f32[1,128], index: 8, kind: input, shape index: {}]   ;;  %s999_s9 = inlined_call_operand.hbm [shape: f32[128,128], index: 9, kind: input, shape index: {}]   ;;  %s1000_s10 = inlined_call_operand.vmem [shape: f32[1,128], index: 10, kind: input, shape index: {}]   ;;  %s1001_s11 = inlined_call_operand.vmem [shape: bf16[32,32], index: 11, kind: input, shape index: {}]   ;;  %s1002_s12 = inlined_call_operand.hbm [shape: f32[32,128], index: 12, kind: output, shape index: {}]  }
   0x1   :  { %18 = vsyncpa [#allocation8], 0 }
   0x2   :  { %19 = vsyncpa [#allocation6], 0  ;;  %s34_s23 = sshll.u32 %s995_s5, 4  ;;  %s764_s24 = smov [#allocation4]   ;;  %s35_s23 = int_to_ptr.hbm [resolvable:$true] %s34_s23 }
   0x3   :  { %s36_s25 = sshll.u32 %s764_s24, 4  ;;  %s53_s28 = sshll.u32 %s999_s9, 4  ;;  %s37_s25 = int_to_ptr.vmem [resolvable:$true] %s36_s25  ;;  %s54_s28 = int_to_ptr.hbm [resolvable:$true] %s53_s28 }
   0x4   :  { %s765_s29 = smov 128   ;;  %s766_s30 = smov 8  }
   0x5   :  { %42 = dma.hbm_to_vmem [thread:$0]  %s35_s23, 2048, %s37_s25, [#allocation5], %s765_s29, %s765_s29, %s766_s30  }
   0x6   :  { %s767_s13 = smov [#allocation7]  }
   0x7   :  { %s55_s14 = sshll.u32 %s767_s13, 4  ;;  %s56_s14 = int_to_ptr.vmem [resolvable:$true] %s55_s14 }
   0x8   :  { %61 = dma.hbm_to_vmem [thread:$0]  %s54_s28, 2048, %s56_s14, [#allocation8], %s765_s29, %s765_s29, %s766_s30  }
   0x9   :  { %756 = dma.done.wait [#allocation5], 2048  }
   0xa   :  { %757 = vsyncadd [#allocation5], 4294965248 }
   0xb   :  { %758 = dma.done.wait [#allocation8], 2048  }
   0xc   :  { %759 = vsyncadd [#allocation8], 4294965248  ;;  %v83_v0 = vld [vmem:[%s1001_s11] sm:$0xff]  ;;  %v85_v1 = vld [vmem:[%s1001_s11 + $0x8] sm:$0xff] }
   0xd   :  { %84 = vst [vmem:[#allocation2] sm:$0xff] %v83_v0 }
   0xe   :  { %86 = vst [vmem:[#allocation2 + $0x8] sm:$0xff] %v85_v1 }
   0xf   :  { %92 = vsyncadd [#allocation3], 256  ;;  %v97_v2 = vld [vmem:[%s991_s1] sm:$0xff]  ;;  %vm102_vm0 = vcmask 64512   ;;  %v179_v4 = vld [vmem:[#allocation4 + $0x78] sm:$0xff] }
  0x10   :  { %v93_v3 = vld [vmem:[%s990_s0] sm:$0xff]  ;;  %130 = vmatpush.msra.mxu0 %v97_v2  ;;  %184 = vmatpush.msra.mxu1 %v179_v4  ;;  %v177_v6 = vld [vmem:[#allocation4 + $0x68] sm:$0xff]  ;;  %v94_v7 = vld [vmem:[%s990_s0 + $0x8] sm:$0xff] }
  0x11   :  { %635 = vmatmul.msk.f32.vlgmr.msra.gmra.mxu0 %vm102_vm0, %v93_v3  ;;  %v178_v5 = vld [vmem:[#allocation4 + $0x70] sm:$0xff]  ;;  %v176_v8 = vld [vmem:[#allocation4 + $0x60] sm:$0xff]  ;;  %v175_v9 = vld [vmem:[#allocation4 + $0x58] sm:$0xff] }
  0x12   :  { %185 = vmatpush.msra.mxu1 %v178_v5  ;;  %v174_v10 = vld [vmem:[#allocation4 + $0x50] sm:$0xff]  ;;  %v173_v11 = vld [vmem:[#allocation4 + $0x48] sm:$0xff]  ;;  %v172_v12 = vld [vmem:[#allocation4 + $0x40] sm:$0xff] }
  0x13   :  { %v95_v13 = vld [vmem:[%s990_s0 + $0x10] sm:$0xff]  ;;  %v171_v14 = vld [vmem:[#allocation4 + $0x38] sm:$0xff]  ;;  %v170_v15 = vld [vmem:[#allocation4 + $0x30] sm:$0xff] }
  0x14   :  { %186 = vmatpush.msra.mxu1 %v177_v6  ;;  %v169_v16 = vld [vmem:[#allocation4 + $0x28] sm:$0xff]  ;;  %v168_v18 = vld [vmem:[#allocation4 + $0x20] sm:$0xff]  ;;  %v167_v19 = vld [vmem:[#allocation4 + $0x18] sm:$0xff] }
  0x15   :  { %v96_v17 = vld [vmem:[%s990_s0 + $0x18] sm:$0xff]  ;;  %v166_v20 = vld [vmem:[#allocation4 + $0x10] sm:$0xff]  ;;  %v164_v22 = vld [vmem:[#allocation4] sm:$0xff] }
  0x16   :  { %187 = vmatpush.msra.mxu1 %v176_v8  ;;  %v165_v21 = vld [vmem:[#allocation4 + $0x8] sm:$0xff]  ;;  %v677_v23 = vld [vmem:[%s992_s2] ss:$0 sm:$0xff]  ;;  %v248_v27 = vld [vmem:[#allocation7 + $0x78] sm:$0xff] }
  0x17   :  { %v678_v26 = vld [vmem:[%s993_s3] ss:$0 sm:$0xff]  ;;  %253 = vmatpush.msra.mxu2 %v248_v27  ;;  %v246_v31 = vld [vmem:[#allocation7 + $0x68] sm:$0xff]  ;;  %v245_v33 = vld [vmem:[#allocation7 + $0x60] sm:$0xff] }
  0x18   :  { %188 = vmatpush.msra.mxu1 %v175_v9  ;;  %v247_v28 = vld [vmem:[#allocation7 + $0x70] sm:$0xff]  ;;  %v244_v35 = vld [vmem:[#allocation7 + $0x58] sm:$0xff]  ;;  %v242_v40 = vld [vmem:[#allocation7 + $0x48] sm:$0xff] }
  0x19   :  { %636 = vmatmul.msk.f32.gmra.mxu0 %vm102_vm0, %v94_v7  ;;  %v679_v30 = vld [vmem:[%s994_s4] ss:$0 sm:$0xff]  ;;  %254 = vmatpush.msra.mxu2 %v247_v28  ;;  %v241_v42 = vld [vmem:[#allocation7 + $0x40] sm:$0xff]  ;;  %v240_v44 = vld [vmem:[#allocation7 + $0x38] sm:$0xff] }
  0x1a   :  { %189 = vmatpush.msra.mxu1 %v174_v10  ;;  %v243_v38 = vld [vmem:[#allocation7 + $0x50] sm:$0xff]  ;;  %v238_v49 = vld [vmem:[#allocation7 + $0x28] sm:$0xff]  ;;  %v237_v57 = vld [vmem:[#allocation7 + $0x20] sm:$0xff] }
  0x1b   :  { %255 = vmatpush.msra.mxu2 %v246_v31  ;;  %v239_v47 = vld [vmem:[#allocation7 + $0x30] sm:$0xff]  ;;  %v236_v58 = vld [vmem:[#allocation7 + $0x18] sm:$0xff]  ;;  %v234_v60 = vld [vmem:[#allocation7 + $0x8] sm:$0xff] }
  0x1c   :  { %190 = vmatpush.msra.mxu1 %v173_v11  ;;  %v235_v59 = vld [vmem:[#allocation7 + $0x10] sm:$0xff]  ;;  %v233_v61 = vld [vmem:[#allocation7] sm:$0xff] }
  0x1d   :  { %256 = vmatpush.msra.mxu2 %v245_v33  ;;  %v680_v62 = vld [vmem:[%s996_s6] ss:$0 sm:$0xff] }
  0x1e   :  { %191 = vmatpush.msra.mxu1 %v172_v12  ;;  %v681_v1 = vld [vmem:[%s997_s7] ss:$0 sm:$0xff] }
  0x1f   :  { %257 = vmatpush.msra.mxu2 %v244_v35  ;;  %v682_v3 = vld [vmem:[%s998_s8] ss:$0 sm:$0xff] }
  0x20   :  { %192 = vmatpush.msra.mxu1 %v171_v14 }
  0x21   :  { %637 = vmatmul.msk.f32.gmra.mxu0 %vm102_vm0, %v95_v13  ;;  %258 = vmatpush.msra.mxu2 %v243_v38 }
  0x22   :  { %193 = vmatpush.msra.mxu1 %v170_v15 }
  0x23   :  { %259 = vmatpush.msra.mxu2 %v242_v40 }
  0x24   :  { %194 = vmatpush.msra.mxu1 %v169_v16 }
  0x25   :  { %260 = vmatpush.msra.mxu2 %v241_v42 }
  0x26   :  { %195 = vmatpush.msra.mxu1 %v168_v18 }
  0x27   :  { %261 = vmatpush.msra.mxu2 %v240_v44 }
  0x28   :  { %196 = vmatpush.msra.mxu1 %v167_v19 }
  0x29   :  { %638 = vmatmul.msk.f32.gmra.mxu0 %vm102_vm0, %v96_v17  ;;  %262 = vmatpush.msra.mxu2 %v239_v47 }
  0x2a   :  { %197 = vmatpush.msra.mxu1 %v166_v20 }
  0x2b   :  { %263 = vmatpush.msra.mxu2 %v238_v49 }
  0x2c   :  { %198 = vmatpush.msra.mxu1 %v165_v21  ;;  %v683_v21 = vld [vmem:[%s1000_s10] ss:$0 sm:$0xff] }
  0x2d   :  { %264 = vmatpush.msra.mxu2 %v237_v57 }
  0x2e   :  { %199 = vmatpush.msra.mxu1 %v164_v22 }
  0x2f   :  { %265 = vmatpush.msra.mxu2 %v236_v58 }
  0x31   :  { %266 = vmatpush.msra.mxu2 %v235_v59 }
  0x33   :  { %267 = vmatpush.msra.mxu2 %v234_v60 }
  0x35   :  { %268 = vmatpush.msra.mxu2 %v233_v61 }
  0x8e   :  { %v132_v24 = vpop.f32.mrf.mxu0 }
  0x8f   :  { %v133_v25 = vadd.f32 %v677_v23, %v132_v24 }
  0x91   :  { %v144_v29 = vmax.f32 %v133_v25, 0.0 }
  0x93   :  { %v152_v32 = vmul.f32 %v678_v26, %v144_v29 }
  0x95   :  { %v160_v34 = vadd.f32 %v679_v30, %v152_v32 }
  0x96   :  { %v135_v36 = vpop.f32.mrf.mxu0 }
  0x97   :  { %v136_v37 = vadd.f32 %v677_v23, %v135_v36  ;;  %200 = vmatmul.f32.vlgmr.msra.gmra.mxu1 %v160_v34 }
  0x99   :  { %v145_v39 = vmax.f32 %v136_v37, 0.0 }
  0x9b   :  { %v153_v41 = vmul.f32 %v678_v26, %v145_v39 }
  0x9d   :  { %v161_v43 = vadd.f32 %v679_v30, %v153_v41 }
  0x9e   :  { %v138_v45 = vpop.f32.mrf.mxu0 }
  0x9f   :  { %v139_v46 = vadd.f32 %v677_v23, %v138_v45  ;;  %203 = vmatmul.f32.gmra.mxu1 %v161_v43 }
  0xa1   :  { %v146_v48 = vmax.f32 %v139_v46, 0.0 }
  0xa3   :  { %v154_v50 = vmul.f32 %v678_v26, %v146_v48 }
  0xa5   :  { %v162_v51 = vadd.f32 %v679_v30, %v154_v50 }
  0xa6   :  { %v141_v52 = vpop.f32.mrf.mxu0 }
  0xa7   :  { %v142_v53 = vadd.f32 %v677_v23, %v141_v52  ;;  %206 = vmatmul.f32.gmra.mxu1 %v162_v51 }
  0xa9   :  { %v147_v54 = vmax.f32 %v142_v53, 0.0 }
  0xab   :  { %v155_v55 = vmul.f32 %v678_v26, %v147_v54 }
  0xad   :  { %v163_v56 = vadd.f32 %v679_v30, %v155_v55 }
  0xaf   :  { %209 = vmatmul.f32.gmra.mxu1 %v163_v56 }
 0x114   :  { %v201_v63 = vpop.f32.mrf.mxu1 }
 0x115   :  { %v202_v0 = vadd.f32 %v680_v62, %v201_v63 }
 0x117   :  { %v213_v2 = vmax.f32 %v202_v0, 0.0 }
 0x119   :  { %v221_v4 = vmul.f32 %v681_v1, %v213_v2 }
 0x11b   :  { %v229_v5 = vadd.f32 %v682_v3, %v221_v4 }
 0x11c   :  { %v204_v6 = vpop.f32.mrf.mxu1 }
 0x11d   :  { %v205_v7 = vadd.f32 %v680_v62, %v204_v6  ;;  %269 = vmatmul.f32.vlgmr.msra.gmra.mxu2 %v229_v5 }
 0x11f   :  { %v214_v8 = vmax.f32 %v205_v7, 0.0 }
 0x121   :  { %v222_v9 = vmul.f32 %v681_v1, %v214_v8 }
 0x123   :  { %v230_v10 = vadd.f32 %v682_v3, %v222_v9 }
 0x124   :  { %v207_v11 = vpop.f32.mrf.mxu1 }
 0x125   :  { %v208_v12 = vadd.f32 %v680_v62, %v207_v11  ;;  %272 = vmatmul.f32.gmra.mxu2 %v230_v10 }
 0x127   :  { %v215_v13 = vmax.f32 %v208_v12, 0.0 }
 0x129   :  { %v223_v14 = vmul.f32 %v681_v1, %v215_v13 }
 0x12b   :  { %v231_v15 = vadd.f32 %v682_v3, %v223_v14 }
 0x12c   :  { %v210_v16 = vpop.f32.mrf.mxu1 }
 0x12d   :  { %v211_v17 = vadd.f32 %v680_v62, %v210_v16  ;;  %275 = vmatmul.f32.gmra.mxu2 %v231_v15 }
 0x12f   :  { %v216_v18 = vmax.f32 %v211_v17, 0.0 }
 0x131   :  { %v224_v19 = vmul.f32 %v681_v1, %v216_v18 }
 0x133   :  { %v232_v20 = vadd.f32 %v682_v3, %v224_v19 }
 0x135   :  { %278 = vmatmul.f32.gmra.mxu2 %v232_v20 }
 0x1a0   :  { %v270_v22 = vpop.f32.mrf.mxu2 }
 0x1a1   :  { %v271_v23 = vadd.f32 %v683_v21, %v270_v22 }
 0x1a8   :  { %v273_v24 = vpop.f32.mrf.mxu2 }
 0x1a9   :  { %v274_v25 = vadd.f32 %v683_v21, %v273_v24 }
 0x1b0   :  { %v276_v26 = vpop.f32.mrf.mxu2 }
 0x1b1   :  { %v277_v27 = vadd.f32 %v683_v21, %v276_v26 }
 0x1b8   :  { %v279_v28 = vpop.f32.mrf.mxu2 }
 0x1b9   :  { %v280_v29 = vadd.f32 %v683_v21, %v279_v28 }
 0x1ba   :  { %760 = dma.done.wait [#allocation3], 256 }
 0x1bb   :  { %761 = vsyncadd [#allocation3], 4294967040  ;;  %v291_v30 = vpack.c.bf16 %v280_v29, %v277_v27  ;;  %v290_v31 = vpack.c.bf16 %v274_v25, %v271_v23  ;;  %vm302_vm1 = vcmask 261120   ;;  %v892_v32 = vld [vmem:[#allocation2] sm:$0xff]  ;;  %v896_v33 = vld [vmem:[#allocation2 + $0x8] sm:$0xff]  ;;  %s768_s8 = smov [#allocation9]  }
 0x1bc   :  { %v900_v38 = vmul.f32 0.1, %v277_v27  ;;  %v902_v39 = vmul.f32 0.1, %v280_v29  ;;  %v904_v42 = vmul.f32 0.1, %v274_v25 }
 0x1bd   :  { %315 = vmatpush.bf16.msra.mxu3 %v291_v30  ;;  %v906_v45 = vmul.f32 0.1, %v271_v23  ;;  %s609_s10 = sshll.u32 %s768_s8, 4  ;;  %s611_s17 = sshll.u32 %s1002_s12, 4  ;;  %s610_s10 = int_to_ptr.vmem [resolvable:$true] %s609_s10  ;;  %s612_s17 = int_to_ptr.hbm [resolvable:$true] %s611_s17 }
 0x1c1   :  { %316 = vmatpush.bf16.msra.mxu3 %v290_v31 }
 0x1c4   :  { %647 = vmatmul.msk.bf16.vlgmr.msra.gmra.mxu3 %vm302_vm1, %v892_v32 }
 0x1d4   :  { %648 = vmatmul.msk.bf16.gmra.mxu3 %vm302_vm1, %v896_v33 }
 0x247   :  { %v318_v34 = vpop.f32.mrf.mxu3 }
 0x248   :  { %v328_v44 = vmul.f32 0.9, %v318_v34 }
 0x24a   :  { %v336_v50 = vadd.f32 %v906_v45, %v328_v44 }
 0x24f   :  { %v320_v35 = vpop.f32.mrf.mxu3 }
 0x250   :  { %v329_v41 = vmul.f32 0.9, %v320_v35 }
 0x252   :  { %v337_v48 = vadd.f32 %v904_v42, %v329_v41 }
 0x254   :  { %v340_v51 = vpack.c.bf16 %v337_v48, %v336_v50 }
 0x257   :  { %v323_v36 = vpop.f32.mrf.mxu3 }
 0x258   :  { %v330_v37 = vmul.f32 0.9, %v323_v36 }
 0x25a   :  { %v338_v46 = vadd.f32 %v900_v38, %v330_v37 }
 0x25f   :  { %v325_v40 = vpop.f32.mrf.mxu3 }
 0x260   :  { %v331_v43 = vmul.f32 0.9, %v325_v40 }
 0x262   :  { %v339_v47 = vadd.f32 %v902_v39, %v331_v43 }
 0x264   :  { %v341_v49 = vpack.c.bf16 %v339_v47, %v338_v46 }
 0x266   :  { %348 = vmatpush.bf16.msrb.mxu0 %v341_v49  ;;  %670 = vmatpush.bf16.msrb.mxu3 %v341_v49 }
 0x26a   :  { %349 = vmatpush.bf16.msrb.mxu0 %v340_v51  ;;  %671 = vmatpush.bf16.msrb.mxu3 %v340_v51 }
 0x26d   :  { %650 = vmatmul.msk.bf16.vlgmr.msrb.gmra.mxu3 %vm302_vm1, %v896_v33  ;;  %649 = vmatmul.msk.bf16.vlgmr.msrb.gmra.mxu0 %vm302_vm1, %v892_v32 }
 0x2ea   :  { %v351_v52 = vpop.f32.mrf.mxu0 }
 0x2eb   :  { %v361_v57 = vmul.f32 0.9, %v351_v52 }
 0x2ed   :  { %v365_v62 = vadd.f32 %v361_v57, %v906_v45 }
 0x2f0   :  { %v356_v53 = vpop.f32.mrf.mxu3 }
 0x2f1   :  { %v363_v55 = vmul.f32 0.9, %v356_v53 }
 0x2f2   :  { %v353_v54 = vpop.f32.mrf.mxu0 }
 0x2f3   :  { %v362_v58 = vmul.f32 0.9, %v353_v54  ;;  %v367_v60 = vadd.f32 %v363_v55, %v900_v38 }
 0x2f5   :  { %v366_v63 = vadd.f32 %v362_v58, %v904_v42 }
 0x2f7   :  { %v369_v1 = vpack.c.bf16 %v366_v63, %v365_v62 }
 0x2f8   :  { %v358_v56 = vpop.f32.mrf.mxu3 }
 0x2f9   :  { %v364_v59 = vmul.f32 0.9, %v358_v56 }
 0x2fb   :  { %v368_v61 = vadd.f32 %v364_v59, %v902_v39 }
 0x2fd   :  { %v370_v0 = vpack.c.bf16 %v368_v61, %v367_v60 }
 0x2ff   :  { %377 = vmatpush.bf16.msra.mxu3 %v370_v0 }
 0x303   :  { %378 = vmatpush.bf16.msra.mxu3 %v369_v1 }
 0x306   :  { %651 = vmatmul.msk.bf16.vlgmr.msra.gmra.mxu3 %vm302_vm1, %v892_v32 }
 0x316   :  { %652 = vmatmul.msk.bf16.gmra.mxu3 %vm302_vm1, %v896_v33 }
 0x389   :  { %v380_v2 = vpop.f32.mrf.mxu3 }
 0x38a   :  { %v390_v9 = vmul.f32 0.9, %v380_v2 }
 0x38c   :  { %v394_v14 = vadd.f32 %v390_v9, %v906_v45 }
 0x391   :  { %v382_v3 = vpop.f32.mrf.mxu3 }
 0x392   :  { %v391_v7 = vmul.f32 0.9, %v382_v3 }
 0x394   :  { %v395_v12 = vadd.f32 %v391_v7, %v904_v42 }
 0x396   :  { %v398_v15 = vpack.c.bf16 %v395_v12, %v394_v14 }
 0x399   :  { %v385_v4 = vpop.f32.mrf.mxu3 }
 0x39a   :  { %v392_v5 = vmul.f32 0.9, %v385_v4 }
 0x39c   :  { %v396_v10 = vadd.f32 %v392_v5, %v900_v38 }
 0x3a1   :  { %v387_v6 = vpop.f32.mrf.mxu3 }
 0x3a2   :  { %v393_v8 = vmul.f32 0.9, %v387_v6 }
 0x3a4   :  { %v397_v11 = vadd.f32 %v393_v8, %v902_v39 }
 0x3a6   :  { %v399_v13 = vpack.c.bf16 %v397_v11, %v396_v10 }
 0x3a8   :  { %406 = vmatpush.bf16.msrb.mxu1 %v399_v13 }
 0x3ac   :  { %407 = vmatpush.bf16.msrb.mxu1 %v398_v15 }
 0x3af   :  { %653 = vmatmul.msk.bf16.vlgmr.msrb.gmra.mxu1 %vm302_vm1, %v892_v32 }
 0x3bf   :  { %654 = vmatmul.msk.bf16.gmra.mxu1 %vm302_vm1, %v896_v33 }
 0x42c   :  { %v409_v16 = vpop.f32.mrf.mxu1 }
 0x42d   :  { %v419_v23 = vmul.f32 0.9, %v409_v16 }
 0x42f   :  { %v423_v28 = vadd.f32 %v419_v23, %v906_v45 }
 0x434   :  { %v411_v17 = vpop.f32.mrf.mxu1 }
 0x435   :  { %v420_v21 = vmul.f32 0.9, %v411_v17 }
 0x437   :  { %v424_v26 = vadd.f32 %v420_v21, %v904_v42 }
 0x439   :  { %v427_v29 = vpack.c.bf16 %v424_v26, %v423_v28 }
 0x43c   :  { %v414_v18 = vpop.f32.mrf.mxu1 }
 0x43d   :  { %v421_v19 = vmul.f32 0.9, %v414_v18 }
 0x43f   :  { %v425_v24 = vadd.f32 %v421_v19, %v900_v38 }
 0x444   :  { %v416_v20 = vpop.f32.mrf.mxu1 }
 0x445   :  { %v422_v22 = vmul.f32 0.9, %v416_v20 }
 0x447   :  { %v426_v25 = vadd.f32 %v422_v22, %v902_v39 }
 0x449   :  { %v428_v27 = vpack.c.bf16 %v426_v25, %v425_v24 }
 0x44b   :  { %435 = vmatpush.bf16.msrb.mxu2 %v428_v27 }
 0x44f   :  { %436 = vmatpush.bf16.msrb.mxu2 %v427_v29 }
 0x452   :  { %655 = vmatmul.msk.bf16.vlgmr.msrb.gmra.mxu2 %vm302_vm1, %v892_v32 }
 0x462   :  { %656 = vmatmul.msk.bf16.gmra.mxu2 %vm302_vm1, %v896_v33 }
 0x4d5   :  { %v438_v30 = vpop.f32.mrf.mxu2 }
 0x4d6   :  { %v448_v41 = vmul.f32 0.9, %v438_v30 }
 0x4d8   :  { %v452_v48 = vadd.f32 %v448_v41, %v906_v45 }
 0x4dd   :  { %v440_v31 = vpop.f32.mrf.mxu2 }
 0x4de   :  { %v449_v37 = vmul.f32 0.9, %v440_v31 }
 0x4e0   :  { %v453_v46 = vadd.f32 %v449_v37, %v904_v42 }
 0x4e2   :  { %v456_v49 = vpack.c.bf16 %v453_v46, %v452_v48 }
 0x4e5   :  { %v443_v34 = vpop.f32.mrf.mxu2 }
 0x4e6   :  { %v450_v35 = vmul.f32 0.9, %v443_v34 }
 0x4e8   :  { %v454_v43 = vadd.f32 %v450_v35, %v900_v38 }
 0x4ed   :  { %v445_v36 = vpop.f32.mrf.mxu2 }
 0x4ee   :  { %v451_v40 = vmul.f32 0.9, %v445_v36 }
 0x4f0   :  { %v455_v44 = vadd.f32 %v451_v40, %v902_v39 }
 0x4f2   :  { %v457_v47 = vpack.c.bf16 %v455_v44, %v454_v43 }
 0x4f4   :  { %464 = vmatpush.bf16.msra.mxu0 %v457_v47 }
 0x4f8   :  { %465 = vmatpush.bf16.msra.mxu0 %v456_v49 }
 0x4fb   :  { %657 = vmatmul.msk.bf16.vlgmr.msra.gmra.mxu0 %vm302_vm1, %v892_v32 }
 0x50b   :  { %658 = vmatmul.msk.bf16.gmra.mxu0 %vm302_vm1, %v896_v33 }
 0x578   :  { %v467_v50 = vpop.f32.mrf.mxu0 }
 0x579   :  { %v477_v57 = vmul.f32 0.9, %v467_v50 }
 0x57b   :  { %v481_v62 = vadd.f32 %v477_v57, %v906_v45 }
 0x580   :  { %v469_v51 = vpop.f32.mrf.mxu0 }
 0x581   :  { %v478_v55 = vmul.f32 0.9, %v469_v51 }
 0x583   :  { %v482_v60 = vadd.f32 %v478_v55, %v904_v42 }
 0x585   :  { %v485_v63 = vpack.c.bf16 %v482_v60, %v481_v62 }
 0x588   :  { %v472_v52 = vpop.f32.mrf.mxu0 }
 0x589   :  { %v479_v53 = vmul.f32 0.9, %v472_v52 }
 0x58b   :  { %v483_v58 = vadd.f32 %v479_v53, %v900_v38 }
 0x590   :  { %v474_v54 = vpop.f32.mrf.mxu0 }
 0x591   :  { %v480_v56 = vmul.f32 0.9, %v474_v54 }
 0x593   :  { %v484_v59 = vadd.f32 %v480_v56, %v902_v39 }
 0x595   :  { %v486_v61 = vpack.c.bf16 %v484_v59, %v483_v58 }
 0x597   :  { %493 = vmatpush.bf16.msrb.mxu3 %v486_v61 }
 0x59b   :  { %494 = vmatpush.bf16.msrb.mxu3 %v485_v63 }
 0x59e   :  { %659 = vmatmul.msk.bf16.vlgmr.msrb.gmra.mxu3 %vm302_vm1, %v892_v32 }
 0x5ae   :  { %660 = vmatmul.msk.bf16.gmra.mxu3 %vm302_vm1, %v896_v33 }
 0x621   :  { %v496_v0 = vpop.f32.mrf.mxu3 }
 0x622   :  { %v506_v7 = vmul.f32 0.9, %v496_v0 }
 0x624   :  { %v510_v12 = vadd.f32 %v506_v7, %v906_v45 }
 0x629   :  { %v498_v1 = vpop.f32.mrf.mxu3 }
 0x62a   :  { %v507_v5 = vmul.f32 0.9, %v498_v1 }
 0x62c   :  { %v511_v10 = vadd.f32 %v507_v5, %v904_v42 }
 0x62e   :  { %v514_v13 = vpack.c.bf16 %v511_v10, %v510_v12 }
 0x631   :  { %v501_v2 = vpop.f32.mrf.mxu3 }
 0x632   :  { %v508_v3 = vmul.f32 0.9, %v501_v2 }
 0x634   :  { %v512_v8 = vadd.f32 %v508_v3, %v900_v38 }
 0x639   :  { %v503_v4 = vpop.f32.mrf.mxu3 }
 0x63a   :  { %v509_v6 = vmul.f32 0.9, %v503_v4 }
 0x63c   :  { %v513_v9 = vadd.f32 %v509_v6, %v902_v39 }
 0x63e   :  { %v515_v11 = vpack.c.bf16 %v513_v9, %v512_v8 }
 0x640   :  { %522 = vmatpush.bf16.msra.mxu1 %v515_v11 }
 0x644   :  { %523 = vmatpush.bf16.msra.mxu1 %v514_v13 }
 0x647   :  { %661 = vmatmul.msk.bf16.vlgmr.msra.gmra.mxu1 %vm302_vm1, %v892_v32 }
 0x657   :  { %662 = vmatmul.msk.bf16.gmra.mxu1 %vm302_vm1, %v896_v33 }
 0x6c4   :  { %v525_v14 = vpop.f32.mrf.mxu1 }
 0x6c5   :  { %v535_v21 = vmul.f32 0.9, %v525_v14 }
 0x6c7   :  { %v539_v26 = vadd.f32 %v535_v21, %v906_v45 }
 0x6cc   :  { %v527_v15 = vpop.f32.mrf.mxu1 }
 0x6cd   :  { %v536_v19 = vmul.f32 0.9, %v527_v15 }
 0x6cf   :  { %v540_v24 = vadd.f32 %v536_v19, %v904_v42 }
 0x6d1   :  { %v543_v27 = vpack.c.bf16 %v540_v24, %v539_v26 }
 0x6d4   :  { %v530_v16 = vpop.f32.mrf.mxu1 }
 0x6d5   :  { %v537_v17 = vmul.f32 0.9, %v530_v16 }
 0x6d7   :  { %v541_v22 = vadd.f32 %v537_v17, %v900_v38 }
 0x6dc   :  { %v532_v18 = vpop.f32.mrf.mxu1 }
 0x6dd   :  { %v538_v20 = vmul.f32 0.9, %v532_v18 }
 0x6df   :  { %v542_v23 = vadd.f32 %v538_v20, %v902_v39 }
 0x6e1   :  { %v544_v25 = vpack.c.bf16 %v542_v23, %v541_v22 }
 0x6e3   :  { %551 = vmatpush.bf16.msra.mxu2 %v544_v25 }
 0x6e7   :  { %552 = vmatpush.bf16.msra.mxu2 %v543_v27 }
 0x6ea   :  { %663 = vmatmul.msk.bf16.vlgmr.msra.gmra.mxu2 %vm302_vm1, %v892_v32 }
 0x6fa   :  { %664 = vmatmul.msk.bf16.gmra.mxu2 %vm302_vm1, %v896_v33 }
 0x76d   :  { %v554_v28 = vpop.f32.mrf.mxu2 }
 0x76e   :  { %v564_v37 = vmul.f32 0.9, %v554_v28 }
 0x770   :  { %v568_v46 = vadd.f32 %v564_v37, %v906_v45 }
 0x775   :  { %v556_v29 = vpop.f32.mrf.mxu2 }
 0x776   :  { %v565_v35 = vmul.f32 0.9, %v556_v29 }
 0x778   :  { %v569_v43 = vadd.f32 %v565_v35, %v904_v42 }
 0x77a   :  { %v572_v47 = vpack.c.bf16 %v569_v43, %v568_v46 }
 0x77d   :  { %v559_v30 = vpop.f32.mrf.mxu2 }
 0x77e   :  { %v566_v31 = vmul.f32 0.9, %v559_v30 }
 0x780   :  { %v570_v40 = vadd.f32 %v566_v31, %v900_v38 }
 0x785   :  { %v561_v34 = vpop.f32.mrf.mxu2 }
 0x786   :  { %v567_v36 = vmul.f32 0.9, %v561_v34 }
 0x788   :  { %v571_v41 = vadd.f32 %v567_v36, %v902_v39 }
 0x78a   :  { %v573_v44 = vpack.c.bf16 %v571_v41, %v570_v40 }
 0x78c   :  { %580 = vmatpush.bf16.msrb.mxu0 %v573_v44 }
 0x790   :  { %581 = vmatpush.bf16.msrb.mxu0 %v572_v47 }
 0x793   :  { %665 = vmatmul.msk.bf16.vlgmr.msrb.gmra.mxu0 %vm302_vm1, %v892_v32 }
 0x7a3   :  { %666 = vmatmul.msk.bf16.gmra.mxu0 %vm302_vm1, %v896_v33 }
 0x810   :  { %v583_v48 = vpop.f32.mrf.mxu0 }
 0x811   :  { %v593_v49 = vmul.f32 0.9, %v583_v48 }
 0x813   :  { %v597_v50 = vadd.f32 %v593_v49, %v906_v45 }
 0x815   :  { %601 = vst [vmem:[#allocation9] sm:$0xff] %v597_v50 }
 0x818   :  { %v585_v51 = vpop.f32.mrf.mxu0 }
 0x819   :  { %v594_v52 = vmul.f32 0.9, %v585_v51 }
 0x81b   :  { %v598_v53 = vadd.f32 %v594_v52, %v904_v42 }
 0x81d   :  { %602 = vst [vmem:[#allocation9 + $0x8] sm:$0xff] %v598_v53 }
 0x820   :  { %v588_v54 = vpop.f32.mrf.mxu0 }
 0x821   :  { %v595_v55 = vmul.f32 0.9, %v588_v54 }
 0x823   :  { %v599_v56 = vadd.f32 %v595_v55, %v900_v38 }
 0x825   :  { %603 = vst [vmem:[#allocation9 + $0x10] sm:$0xff] %v599_v56 }
 0x828   :  { %v590_v57 = vpop.f32.mrf.mxu0 }
 0x829   :  { %v596_v32 = vmul.f32 0.9, %v590_v57 }
 0x82b   :  { %v600_v33 = vadd.f32 %v596_v32, %v902_v39 }
 0x82d   :  { %604 = vst [vmem:[#allocation9 + $0x18] sm:$0xff] %v600_v33 }
 0x82e   :  { %617 = dma.vmem_to_hbm [thread:$0]  %s610_s10, 512, %s612_s17, [#allocation6], %s765_s29, %s765_s29, %s766_s30  }
 0x82f   :  { %762 = dma.done.wait [#allocation6], 512  }
 0x830   :  { %763 = vsyncadd [#allocation6], 4294966784 }
 0x831   :  { %622 = vsyncpa [#allocation5], 1 }
 0x832   :  { %623 = vsyncpa [#allocation8], 1 }
 0x833   :  { %624 = vsyncpa [#allocation6], 1 }
 0x834   :  { %625 = vsyncmov [#allocation3] }
 0x837   :  { %s626_s18 = vpop.sfrf %625 }
 0x838   :  { %p667_p0 = scmp.ne.s32.totalorder %s626_s18, 0 }
 0x83a   :  { %630 = shalt.err (%p667_p0)  }

</bundles_post_ra>
